<compile_context>
chip_gen: v7x
topology: tpu7x:2x2x1
jax: 0.10.0
libtpu: 0.0.40
codegen_flags: <defaults>
</compile_context>

<pallas_src>
import functools

import jax
import jax.numpy as jnp
from jax.experimental import pallas as pl
from jax.experimental.pallas import tpu as pltpu

_LANE = 128
_SUB = 8


def _pick_rc(R, sub, target_rows, min_exact_rows):
    """Largest chunk-row count rc (multiple of `sub`, <= target_rows) dividing R.

    Prefers an even chunk count (pipelining + v7x core split) when that costs at
    most a 2x smaller chunk.  Returns None when only pathologically small exact
    chunks exist for a large R (zero-padding is then cheaper)."""
    if R % sub != 0:
        return None
    cap = min(target_rows, R)
    cap -= cap % sub
    best = None
    rc = cap
    while rc >= sub:
        if R % rc == 0:
            if best is None:
                best = rc
            if (R // rc) % 2 == 0:
                if 2 * rc >= best:
                    best = rc
                break
        rc -= sub
    if best is None:
        return None
    if best < min_exact_rows and R > target_rows:
        return None  # exact tiling would force thousands of tiny chunks -> pad instead
    return best


def _ohem_kernel(x_ref, t_ref, o_ref, s1_ref, s3_ref, mn_ref, mx_ref,
                 *, rc, fold, chw, n_per_split, n_chunks, padded):
    s = pl.program_id(1)          # core-split axis  (parallel)
    c = pl.program_id(2)          # chunk axis       (arbitrary / innermost)

    @pl.when(c == 0)
    def _():
        s1_ref[...] = jnp.zeros((_SUB, _LANE), jnp.float32)
        s3_ref[...] = jnp.zeros((_SUB, _LANE), jnp.float32)
        mn_ref[...] = jnp.full((_SUB, _LANE), jnp.inf, jnp.float32)
        mx_ref[...] = jnp.full((_SUB, _LANE), -jnp.inf, jnp.float32)

    g = fold // _SUB
    if padded:
        glob = s * n_per_split + c                  # global chunk index
        is_last_chunk = glob == (n_chunks - 1)      # only this chunk has padding
        chunk_base = glob * (rc * _LANE)            # flat index of chunk start
    else:
        is_last_chunk = None
        chunk_base = None

    def fold_block(off):
        if not isinstance(off, int):
            off = pl.multiple_of(off, fold)
        xs = x_ref[0, pl.ds(off, fold), :].astype(jnp.float32)   # (fold, 128)
        ts = t_ref[0, pl.ds(off, fold), :].astype(jnp.float32)
        d = xs - ts
        ad = jnp.abs(d)
        d2 = d * d                        # elementwise MSE, reduction='none'
        # In-register fold down to a single (8,128) vreg, then one accumulator
        # RMW per quantity per sub-block (instead of per data vreg).
        s1_ref[...] += ad.reshape(g, _SUB, _LANE).sum(axis=0)
        s3_ref[...] += (d2 * ad).reshape(g, _SUB, _LANE).sum(axis=0)
        mx_ref[...] = jnp.maximum(mx_ref[...], d2.reshape(g, _SUB, _LANE).max(axis=0))

        if not padded:
            mn_ref[...] = jnp.minimum(mn_ref[...], d2.reshape(g, _SUB, _LANE).min(axis=0))
        else:
            # x and t are zero-padded identically -> d == 0 in the pad region,
            # so sums and max need no mask; only min does, and only on the
            # globally-last chunk.
            @pl.when(jnp.logical_not(is_last_chunk))
            def _():
                mn_ref[...] = jnp.minimum(
                    mn_ref[...], d2.reshape(g, _SUB, _LANE).min(axis=0))

            @pl.when(is_last_chunk)
            def _():
                row = jax.lax.broadcasted_iota(jnp.int32, (fold, _LANE), 0)
                lane = jax.lax.broadcasted_iota(jnp.int32, (fold, _LANE), 1)
                flat = chunk_base + (off + row) * _LANE + lane
                d2m = jnp.where(flat < chw, d2, jnp.inf)
                mn_ref[...] = jnp.minimum(
                    mn_ref[...], d2m.reshape(g, _SUB, _LANE).min(axis=0))

    n_inner = rc // fold
    if n_inner == 1:
        fold_block(0)
    else:
        @pl.loop(0, n_inner)
        def _(i):
            fold_block(i * fold)

    @pl.when(c == n_per_split - 1)
    def _():
        # Lane-dense partial slab for this (batch, split); the scalar math and
        # global mean happen in a tiny JAX epilogue.
        o_ref[0, 0, 0:8, :] = s1_ref[...]
        o_ref[0, 0, 8:16, :] = s3_ref[...]
        o_ref[0, 0, 16:24, :] = mn_ref[...]
        o_ref[0, 0, 24:32, :] = mx_ref[...]


def ohem2d(x, t, *, target_rows=8192, fold_rows=128, min_exact_rows=128):
    """OHEM2d forward: mean(|10*(d^2 - dmin)/(dmax - dmin) * d|), d = x - t."""
    assert x.shape == t.shape and x.ndim >= 2
    assert x.dtype == t.dtype and jnp.issubdtype(x.dtype, jnp.floating)
    B = x.shape[0]
    chw = 1
    for dim in x.shape[1:]:
        chw *= int(dim)

    # bf16/f16 pack two rows per sublane -> row granularity 16; f32 -> 8.
    sub = _SUB if jnp.dtype(x.dtype).itemsize >= 4 else 2 * _SUB
    target_rows = max(sub, target_rows - target_rows % sub)
    fold_rows = max(sub, fold_rows - fold_rows % sub)

    rc = _pick_rc(chw // _LANE, sub, target_rows, min_exact_rows) \
        if chw % _LANE == 0 else None
    if rc is not None:
        padded = False
        n_chunks = (chw // _LANE) // rc
        chw_pad = chw
    else:
        padded = True                      # ragged CHW: zero-pad, masked in-kernel
        min_chunk = sub * _LANE
        chunk = min(target_rows * _LANE, pl.cdiv(chw, min_chunk) * min_chunk)
        rc = chunk // _LANE
        n_chunks = pl.cdiv(chw, chunk)
        chw_pad = n_chunks * chunk

    # Inner in-register fold width: keeps the traced body compact and the live
    # vreg set comfortably under 64 regardless of the chunk size.
    fold = min(fold_rows, rc)
    while rc % fold != 0:
        fold -= sub

    # Split the chunk axis in two so v7x's second TensorCore has work even when
    # B == 1 (harmless serial loop on single-core v5e/v6e).
    n_split = 2 if (n_chunks % 2 == 0 and n_chunks >= 2) else 1
    n_per_split = n_chunks // n_split

    x2 = x.reshape(B, chw)
    t2 = t.reshape(B, chw)
    if padded:
        pad = chw_pad - chw
        x2 = jnp.pad(x2, ((0, 0), (0, pad)))
        t2 = jnp.pad(t2, ((0, 0), (0, pad)))
    x3 = x2.reshape(B, chw_pad // _LANE, _LANE)
    t3 = t2.reshape(B, chw_pad // _LANE, _LANE)

    kernel = functools.partial(
        _ohem_kernel, rc=rc, fold=fold, chw=chw,
        n_per_split=n_per_split, n_chunks=n_chunks, padded=padded)

    parts = pl.pallas_call(
        kernel,
        out_shape=jax.ShapeDtypeStruct((B, n_split, 4 * _SUB, _LANE), jnp.float32),
        grid_spec=pltpu.PrefetchScalarGridSpec(
            num_scalar_prefetch=0,
            grid=(B, n_split, n_per_split),
            in_specs=[
                pl.BlockSpec((1, rc, _LANE),
                             lambda b, s, c: (b, s * n_per_split + c, 0)),
                pl.BlockSpec((1, rc, _LANE),
                             lambda b, s, c: (b, s * n_per_split + c, 0)),
            ],
            out_specs=pl.BlockSpec((1, 1, 4 * _SUB, _LANE),
                                   lambda b, s, c: (b, s, 0, 0)),
            scratch_shapes=[
                pltpu.VMEM((_SUB, _LANE), jnp.float32),   # sum |d|
                pltpu.VMEM((_SUB, _LANE), jnp.float32),   # sum |d|^3
                pltpu.VMEM((_SUB, _LANE), jnp.float32),   # min d^2
                pltpu.VMEM((_SUB, _LANE), jnp.float32),   # max d^2
            ],
        ),
        compiler_params=pltpu.CompilerParams(
            dimension_semantics=("parallel", "parallel", "arbitrary"),
            # 2 inputs x 2 pipeline buffers x <=4 MiB tiles + tiny scratch:
            # well under v7x's 64 MiB physical VMEM.
            vmem_limit_bytes=48 * 1024 * 1024,
        ),
    )(x3, t3)

    parts = parts.reshape(B, n_split, 4, _SUB, _LANE)
    s1 = jnp.sum(parts[:, :, 0], axis=(1, 2, 3))
    s3 = jnp.sum(parts[:, :, 1], axis=(1, 2, 3))
    dmin = jnp.min(parts[:, :, 2], axis=(1, 2, 3))
    dmax = jnp.max(parts[:, :, 3], axis=(1, 2, 3))
    # sum_b |scaled * d| = 10/(dmax-dmin) * (sum|d|^3 - dmin * sum|d|)
    per_batch = 10.0 * (s3 - dmin * s1) / (dmax - dmin)
    return jnp.sum(per_batch) / jnp.float32(B * chw)


def _ohem2d_ref(x, t):
    """Pure-JAX reference mirroring the PyTorch forward."""
    d = x - t
    diff = d * d
    B = x.shape[0]
    flat = diff.reshape(B, -1)
    bshape = (B,) + (1,) * (x.ndim - 1)
    dmin = flat.min(axis=1).reshape(bshape)
    dmax = flat.max(axis=1).reshape(bshape)
    scaled = 10.0 * (diff - dmin) / (dmax - dmin)
    return jnp.mean(jnp.abs(scaled * d))


if __name__ == "__main__":
    key = jax.random.PRNGKey(0)
    ks = jax.random.split(key, 10)

    def _check(x, t, **kw):
        out = jax.block_until_ready(ohem2d(x, t, **kw))
        ref = _ohem2d_ref(x, t)
        assert jnp.allclose(out, ref, rtol=1e-4, atol=1e-5), (out, ref)

    # 1) 4D NCHW, CHW lane-aligned, single chunk, no padding.
    x = jax.random.normal(ks[0], (2, 4, 16, 16), dtype=jnp.float32)
    t = jax.random.normal(ks[1], (2, 4, 16, 16), dtype=jnp.float32)
    _check(x, t)

    # 2) 3D input, ragged CHW -> zero-pad + last-chunk min mask.
    x = jax.random.normal(ks[2], (2, 5, 60), dtype=jnp.float32)
    t = jax.random.normal(ks[3], (2, 5, 60), dtype=jnp.float32)
    _check(x, t)

    # 3) Exact tiling with an even chunk count -> exercises the 2-way core split.
    x = jax.random.normal(ks[4], (2, 4, 64, 128), dtype=jnp.float32)
    t = jax.random.normal(ks[5], (2, 4, 64, 128), dtype=jnp.float32)
    _check(x, t)

    # 4) B=1 with a larger CHW -> exercises the inner pl.loop fold path.
    x = jax.random.normal(ks[6], (1, 8, 128, 128), dtype=jnp.float32)
    t = jax.random.normal(ks[7], (1, 8, 128, 128), dtype=jnp.float32)
    _check(x, t)

    # 5) Ragged CHW forced into several chunks -> padded + split + mask-only-last.
    x = jax.random.normal(ks[8], (2, 3, 33, 33), dtype=jnp.float32)
    t = jax.random.normal(ks[9], (2, 3, 33, 33), dtype=jnp.float32)
    _check(x, t, target_rows=8)

    print("KERNEL_OK")
</pallas_src>

<mosaic_0001>
module attributes {stable_mosaic.version = 11 : i64} {
  func.func @_ohem_kernel(%arg0: i32, %arg1: i32, %arg2: i32, %arg3: memref<1x8x128xf32, #tpu.memory_space<vmem>>, %arg4: memref<1x8x128xf32, #tpu.memory_space<vmem>>, %arg5: memref<1x1x32x128xf32, #tpu.memory_space<vmem>>, %arg6: memref<8x128xf32, #tpu.memory_space<vmem>>, %arg7: memref<8x128xf32, #tpu.memory_space<vmem>>, %arg8: memref<8x128xf32, #tpu.memory_space<vmem>>, %arg9: memref<8x128xf32, #tpu.memory_space<vmem>>) attributes {dimension_semantics = [#tpu.dimension_semantics<parallel>, #tpu.dimension_semantics<parallel>, #tpu.dimension_semantics<arbitrary>], iteration_bounds = array<i64: 2, 1, 1>, scalar_prefetch = 0 : i64, scratch_operands = 4 : i64, tpu.core_type = #tpu.core_type<tc>, window_params = [{transform_indices = @transform_0, window_bounds = array<i64: 1, 8, 128>}, {transform_indices = @transform_1, window_bounds = array<i64: 1, 8, 128>}, {transform_indices = @transform_2, window_bounds = array<i64: 1, 1, 32, 128>}]} {
    %c0_i32 = arith.constant 0 : i32
    %0 = arith.cmpi eq, %arg2, %c0_i32 : i32
    %1 = arith.extui %0 : i1 to i32
    %c0_i32_0 = arith.constant 0 : i32
    %2 = arith.cmpi ne, %1, %c0_i32_0 : i32
    scf.if %2 {
      %cst_27 = arith.constant 0.000000e+00 : f32
      %34 = vector.broadcast %cst_27 : f32 to vector<8x128xf32>
      %c0_28 = arith.constant 0 : index
      %c0_29 = arith.constant 0 : index
      %35 = vector.load %arg6[%c0_28, %c0_29] : memref<8x128xf32, #tpu.memory_space<vmem>>, vector<8x128xf32>
      tpu.vector_store %arg6[%c0_28, %c0_29], %34 {strides = array<i32>} : memref<8x128xf32, #tpu.memory_space<vmem>>, vector<8x128xf32>,
      %cst_30 = arith.constant 0.000000e+00 : f32
      %36 = vector.broadcast %cst_30 : f32 to vector<8x128xf32>
      %c0_31 = arith.constant 0 : index
      %c0_32 = arith.constant 0 : index
      %37 = vector.load %arg7[%c0_31, %c0_32] : memref<8x128xf32, #tpu.memory_space<vmem>>, vector<8x128xf32>
      tpu.vector_store %arg7[%c0_31, %c0_32], %36 {strides = array<i32>} : memref<8x128xf32, #tpu.memory_space<vmem>>, vector<8x128xf32>,
      %cst_33 = arith.constant 0x7F800000 : f32
      %38 = vector.broadcast %cst_33 : f32 to vector<8x128xf32>
      %c0_34 = arith.constant 0 : index
      %c0_35 = arith.constant 0 : index
      %39 = vector.load %arg8[%c0_34, %c0_35] : memref<8x128xf32, #tpu.memory_space<vmem>>, vector<8x128xf32>
      tpu.vector_store %arg8[%c0_34, %c0_35], %38 {strides = array<i32>} : memref<8x128xf32, #tpu.memory_space<vmem>>, vector<8x128xf32>,
      %cst_36 = arith.constant 0xFF800000 : f32
      %40 = vector.broadcast %cst_36 : f32 to vector<8x128xf32>
      %c0_37 = arith.constant 0 : index
      %c0_38 = arith.constant 0 : index
      %41 = vector.load %arg9[%c0_37, %c0_38] : memref<8x128xf32, #tpu.memory_space<vmem>>, vector<8x128xf32>
      tpu.vector_store %arg9[%c0_37, %c0_38], %40 {strides = array<i32>} : memref<8x128xf32, #tpu.memory_space<vmem>>, vector<8x128xf32>,
    } else {
    }
    %c0 = arith.constant 0 : index
    %c0_1 = arith.constant 0 : index
    %c0_2 = arith.constant 0 : index
    %3 = vector.load %arg3[%c0, %c0_1, %c0_2] : memref<1x8x128xf32, #tpu.memory_space<vmem>>, vector<1x8x128xf32>
    %4 = vector.shape_cast %3 : vector<1x8x128xf32> to vector<8x128xf32>
    %c0_3 = arith.constant 0 : index
    %c0_4 = arith.constant 0 : index
    %c0_5 = arith.constant 0 : index
    %5 = vector.load %arg4[%c0_3, %c0_4, %c0_5] : memref<1x8x128xf32, #tpu.memory_space<vmem>>, vector<1x8x128xf32>
    %6 = vector.shape_cast %5 : vector<1x8x128xf32> to vector<8x128xf32>
    %7 = arith.subf %4, %6 : vector<8x128xf32>
    %8 = math.absf %7 : vector<8x128xf32>
    %9 = arith.mulf %7, %7 : vector<8x128xf32>
    %c0_6 = arith.constant 0 : index
    %c0_7 = arith.constant 0 : index
    %10 = vector.load %arg6[%c0_6, %c0_7] : memref<8x128xf32, #tpu.memory_space<vmem>>, vector<8x128xf32>
    %11 = vector.shape_cast %8 : vector<8x128xf32> to vector<1x8x128xf32>
    %cst = arith.constant dense<0.000000e+00> : vector<8x128xf32>
    %12 = vector.multi_reduction <add>, %11, %cst [0] : vector<1x8x128xf32> to vector<8x128xf32>
    %13 = arith.addf %10, %12 : vector<8x128xf32>
    %c0_8 = arith.constant 0 : index
    %c0_9 = arith.constant 0 : index
    %14 = vector.load %arg6[%c0_8, %c0_9] : memref<8x128xf32, #tpu.memory_space<vmem>>, vector<8x128xf32>
    tpu.vector_store %arg6[%c0_8, %c0_9], %13 {strides = array<i32>} : memref<8x128xf32, #tpu.memory_space<vmem>>, vector<8x128xf32>,
    %c0_10 = arith.constant 0 : index
    %c0_11 = arith.constant 0 : index
    %15 = vector.load %arg7[%c0_10, %c0_11] : memref<8x128xf32, #tpu.memory_space<vmem>>, vector<8x128xf32>
    %16 = arith.mulf %9, %8 : vector<8x128xf32>
    %17 = vector.shape_cast %16 : vector<8x128xf32> to vector<1x8x128xf32>
    %cst_12 = arith.constant dense<0.000000e+00> : vector<8x128xf32>
    %18 = vector.multi_reduction <add>, %17, %cst_12 [0] : vector<1x8x128xf32> to vector<8x128xf32>
    %19 = arith.addf %15, %18 : vector<8x128xf32>
    %c0_13 = arith.constant 0 : index
    %c0_14 = arith.constant 0 : index
    %20 = vector.load %arg7[%c0_13, %c0_14] : memref<8x128xf32, #tpu.memory_space<vmem>>, vector<8x128xf32>
    tpu.vector_store %arg7[%c0_13, %c0_14], %19 {strides = array<i32>} : memref<8x128xf32, #tpu.memory_space<vmem>>, vector<8x128xf32>,
    %c0_15 = arith.constant 0 : index
    %c0_16 = arith.constant 0 : index
    %21 = vector.load %arg9[%c0_15, %c0_16] : memref<8x128xf32, #tpu.memory_space<vmem>>, vector<8x128xf32>
    %22 = vector.shape_cast %9 : vector<8x128xf32> to vector<1x8x128xf32>
    %cst_17 = arith.constant dense<0xFF800000> : vector<8x128xf32>
    %23 = vector.multi_reduction <maximumf>, %22, %cst_17 [0] : vector<1x8x128xf32> to vector<8x128xf32>
    %24 = arith.maximumf %21, %23 : vector<8x128xf32>
    %c0_18 = arith.constant 0 : index
    %c0_19 = arith.constant 0 : index
    %25 = vector.load %arg9[%c0_18, %c0_19] : memref<8x128xf32, #tpu.memory_space<vmem>>, vector<8x128xf32>
    tpu.vector_store %arg9[%c0_18, %c0_19], %24 {strides = array<i32>} : memref<8x128xf32, #tpu.memory_space<vmem>>, vector<8x128xf32>,
    %c0_20 = arith.constant 0 : index
    %c0_21 = arith.constant 0 : index
    %26 = vector.load %arg8[%c0_20, %c0_21] : memref<8x128xf32, #tpu.memory_space<vmem>>, vector<8x128xf32>
    %27 = vector.shape_cast %9 : vector<8x128xf32> to vector<1x8x128xf32>
    %cst_22 = arith.constant dense<0x7F800000> : vector<8x128xf32>
    %28 = vector.multi_reduction <minimumf>, %27, %cst_22 [0] : vector<1x8x128xf32> to vector<8x128xf32>
    %29 = arith.minimumf %26, %28 : vector<8x128xf32>
    %c0_23 = arith.constant 0 : index
    %c0_24 = arith.constant 0 : index
    %30 = vector.load %arg8[%c0_23, %c0_24] : memref<8x128xf32, #tpu.memory_space<vmem>>, vector<8x128xf32>
    tpu.vector_store %arg8[%c0_23, %c0_24], %29 {strides = array<i32>} : memref<8x128xf32, #tpu.memory_space<vmem>>, vector<8x128xf32>,
    %c0_i32_25 = arith.constant 0 : i32
    %31 = arith.cmpi eq, %arg2, %c0_i32_25 : i32
    %32 = arith.extui %31 : i1 to i32
    %c0_i32_26 = arith.constant 0 : i32
    %33 = arith.cmpi ne, %32, %c0_i32_26 : i32
    scf.if %33 {
      %c0_27 = arith.constant 0 : index
      %c0_28 = arith.constant 0 : index
      %34 = vector.load %arg6[%c0_27, %c0_28] : memref<8x128xf32, #tpu.memory_space<vmem>>, vector<8x128xf32>
      %c0_29 = arith.constant 0 : index
      %c0_30 = arith.constant 0 : index
      %c0_31 = arith.constant 0 : index
      %c0_32 = arith.constant 0 : index
      %35 = vector.load %arg5[%c0_29, %c0_30, %c0_31, %c0_32] : memref<1x1x32x128xf32, #tpu.memory_space<vmem>>, vector<1x1x8x128xf32>
      %36 = vector.shape_cast %35 : vector<1x1x8x128xf32> to vector<8x128xf32>
      %37 = vector.shape_cast %34 : vector<8x128xf32> to vector<1x1x8x128xf32>
      tpu.vector_store %arg5[%c0_29, %c0_30, %c0_31, %c0_32], %37 {strides = array<i32>} : memref<1x1x32x128xf32, #tpu.memory_space<vmem>>, vector<1x1x8x128xf32>,
      %c0_33 = arith.constant 0 : index
      %c0_34 = arith.constant 0 : index
      %38 = vector.load %arg7[%c0_33, %c0_34] : memref<8x128xf32, #tpu.memory_space<vmem>>, vector<8x128xf32>
      %c0_35 = arith.constant 0 : index
      %c0_36 = arith.constant 0 : index
      %c8 = arith.constant 8 : index
      %c0_37 = arith.constant 0 : index
      %39 = vector.load %arg5[%c0_35, %c0_36, %c8, %c0_37] : memref<1x1x32x128xf32, #tpu.memory_space<vmem>>, vector<1x1x8x128xf32>
      %40 = vector.shape_cast %39 : vector<1x1x8x128xf32> to vector<8x128xf32>
      %41 = vector.shape_cast %38 : vector<8x128xf32> to vector<1x1x8x128xf32>
      tpu.vector_store %arg5[%c0_35, %c0_36, %c8, %c0_37], %41 {strides = array<i32>} : memref<1x1x32x128xf32, #tpu.memory_space<vmem>>, vector<1x1x8x128xf32>,
      %c0_38 = arith.constant 0 : index
      %c0_39 = arith.constant 0 : index
      %42 = vector.load %arg8[%c0_38, %c0_39] : memref<8x128xf32, #tpu.memory_space<vmem>>, vector<8x128xf32>
      %c0_40 = arith.constant 0 : index
      %c0_41 = arith.constant 0 : index
      %c16 = arith.constant 16 : index
      %c0_42 = arith.constant 0 : index
      %43 = vector.load %arg5[%c0_40, %c0_41, %c16, %c0_42] : memref<1x1x32x128xf32, #tpu.memory_space<vmem>>, vector<1x1x8x128xf32>
      %44 = vector.shape_cast %43 : vector<1x1x8x128xf32> to vector<8x128xf32>
      %45 = vector.shape_cast %42 : vector<8x128xf32> to vector<1x1x8x128xf32>
      tpu.vector_store %arg5[%c0_40, %c0_41, %c16, %c0_42], %45 {strides = array<i32>} : memref<1x1x32x128xf32, #tpu.memory_space<vmem>>, vector<1x1x8x128xf32>,
      %c0_43 = arith.constant 0 : index
      %c0_44 = arith.constant 0 : index
      %46 = vector.load %arg9[%c0_43, %c0_44] : memref<8x128xf32, #tpu.memory_space<vmem>>, vector<8x128xf32>
      %c0_45 = arith.constant 0 : index
      %c0_46 = arith.constant 0 : index
      %c24 = arith.constant 24 : index
      %c0_47 = arith.constant 0 : index
      %47 = vector.load %arg5[%c0_45, %c0_46, %c24, %c0_47] : memref<1x1x32x128xf32, #tpu.memory_space<vmem>>, vector<1x1x8x128xf32>
      %48 = vector.shape_cast %47 : vector<1x1x8x128xf32> to vector<8x128xf32>
      %49 = vector.shape_cast %46 : vector<8x128xf32> to vector<1x1x8x128xf32>
      tpu.vector_store %arg5[%c0_45, %c0_46, %c24, %c0_47], %49 {strides = array<i32>} : memref<1x1x32x128xf32, #tpu.memory_space<vmem>>, vector<1x1x8x128xf32>,
    } else {
    }
    return
  }
  func.func @transform_0(%arg0: i32, %arg1: i32, %arg2: i32) -> (i32, i32, i32) {
    %c1_i32 = arith.constant 1 : i32
    %0 = arith.muli %arg1, %c1_i32 : i32
    %1 = arith.addi %0, %arg2 : i32
    %c0_i32 = arith.constant 0 : i32
    %c0_i32_0 = arith.constant 0 : i32
    return %arg0, %1, %c0_i32 : i32, i32, i32
  }
  func.func @transform_1(%arg0: i32, %arg1: i32, %arg2: i32) -> (i32, i32, i32) {
    %c1_i32 = arith.constant 1 : i32
    %0 = arith.muli %arg1, %c1_i32 : i32
    %1 = arith.addi %0, %arg2 : i32
    %c0_i32 = arith.constant 0 : i32
    %c0_i32_0 = arith.constant 0 : i32
    return %arg0, %1, %c0_i32 : i32, i32, i32
  }
  func.func @transform_2(%arg0: i32, %arg1: i32, %arg2: i32) -> (i32, i32, i32, i32) {
    %c0_i32 = arith.constant 0 : i32
    %c0_i32_0 = arith.constant 0 : i32
    %c0_i32_1 = arith.constant 0 : i32
    return %arg0, %arg1, %c0_i32, %c0_i32_0 : i32, i32, i32, i32
  }
}

</mosaic_0001>

<bundles_post_ra>
// kernel: tpu_custom_call.1
= control target key start
LH: loop header
LB: loop body
LE: loop exit
PB: predicated region body
PF: predicated region fallthrough
CT: control target
= control target key end

     0   :  { %7 = vsyncpa [#allocation7], 0  ;;  %s878_s0 = inlined_call_operand.hbm [shape: f32[2,8,128], index: 0, kind: input, shape index: {}]   ;;  %s879_s1 = inlined_call_operand.hbm [shape: f32[2,8,128], index: 1, kind: input, shape index: {}]   ;;  %s880_s2 = inlined_call_operand.hbm [shape: f32[2,1,32,128], index: 2, kind: output, shape index: {}]  }
   0x1   :  { %9 = vsyncpa [#allocation7 + $0x1], 0 }
   0x2   :  { %10 = vsyncpa [#allocation10], 0 }
   0x3   :  { %12 = vsyncpa [#allocation10 + $0x1], 0 }
   0x4   :  { %13 = vsyncpa [#allocation8], 0 }
   0x5   :  { %15 = vsyncpa [#allocation8 + $0x1], 0  ;;  %s655_s9 = smov 0   ;;  %s657_s10 = smov 0  }
   0x6   :  { %s659_s11 = smov 0   ;;  %s661_s12 = smov 0  }
   0x7   :  { %s663_s13 = smov 0   ;;  %s665_s14 = smov 0  }
   0x8 LB: > { %s400_s15 = sadd.s32 4294967295, %s633_s14   ;;  %s401_s16 = sadd.s32 4294967294, %s633_s14   ;;  %s633_s14 = sphi %s665_s14, %s21_s14   ;;  %s629_s13 = sphi %s663_s13, %s900_s13   ;;  %s625_s12 = sphi %s661_s12, %s899_s12   ;;  %s621_s11 = sphi %s659_s11, %s898_s11   ;;  %s617_s10 = sphi %s657_s10, %s897_s10   ;;  %s613_s9 = sphi %s655_s9, %s896_s9  }
   0x9   : > { %s40_s17 = sadd.s32 1, %s629_s13  ;;  %s51_s18 = sadd.s32 1, %s621_s11 }
   0xa   : > { %p42_p0 = scmp.ge.s32.totalorder %s40_s17, 2  ;;  %p58_p1 = scmp.ne.s32.totalorder %s621_s11, %s617_s10 }
   0xb   : > { %p59_p2 = scmp.eq.s32.totalorder %s633_s14, 0  ;;  %p64_p3 = scmp.ne.s32.totalorder %s617_s10, %s613_s9 }
   0xc   : > { %s902_s17 = smov (%p42_p0, %s40_s17), 0  ;;  %p65_p5 = scmp.eq.s32.totalorder %s400_s15, 0 }
   0xd   : > { %p696_p4 = por %p59_p2, %p58_p1  ;;  %s46_s20 = ssub.s32 %s629_s13, %s902_s17 }
   0xe   : > { %p120_p6 = scmp.eq.s32.totalorder %s400_s15, 1  ;;  %p49_p7 = scmp.eq.s32.totalorder %s46_s20, 0 }
   0xf   : > { %p702_p8 = por %p65_p5, %p64_p3  ;;  %p126_p10 = scmp.eq.s32.totalorder %s401_s16, 1 }
  0x10   : > { %p706_p9 = por %p120_p6, %p58_p1  ;;  %p435_p13 = scmp.lt.s32.totalorder %s633_s14, 2 }
  0x11   : > { %s884_s21 = scalar_select %p702_p8, 1, 0 }
  0x12   : > { %s885_s22 = scalar_select %p706_p9, 1, 0 }
  0x13   : > { %s711_s23 = scalar_select %p49_p7, %s621_s11, %s51_s18  }
  0x14   : > { %p713_p11 = por %p126_p10, %p64_p3  ;;  %s720_s25 = sand.u32 1, %s621_s11  }
  0x15   : > { %s404_s26 = sshll.u32 %s720_s25, 3  ;;  %s405_s27 = sshll.u32 %s629_s13, 7 }
  0x16   : > { %s886_s24 = scalar_select %p713_p11, 1, 0 }
  0x17   : > { %s729_s30 = scalar_lea.hbm %s878_s0, %s405_s27  ;;  %s150_s3 = scalar_lea.vmem [#allocation6], %s404_s26 }
  0x18   : > { %s159_s4 = sshll.u32 %s150_s3, 4  ;;  %p737_p0 = pnand %p435_p13, %p696_p4  ;;  %s733_s4 = int_to_ptr.vmem [resolvable:$true] %s159_s4 }
  0x19   : > { %s147_s6 = scalar_lea.sflag [#allocation7], %s720_s25  ;;  %s487_s7 = scalar_lea.hbm %s729_s30, 128 }
  0x1a   : > { %p488_p3 = scmp.ne.s32.totalorder %s729_s30, %s487_s7  ;;  %p489_p5 = pneg %p737_p0 }
  0x1b   : > { %s492_s16 = scalar_lea.hbm %s878_s0, 256  ;;  %p493_p4 = scmp.lt.u32.totalorder %s729_s30, %s878_s0 }
  0x1c   : > { %p490_p6 = pnand %p489_p5, %p488_p3  ;;  %p494_p10 = scmp.lt.u32.totalorder %s492_s16, %s487_s7 }
  0x1d   : > { %p496_p12 = scmp.lt.u32.totalorder %s487_s7, %s729_s30 }
  0x1e   : > { %p491_p7 = pneg %p490_p6  ;;  %p495_p13 = por %p494_p10, %p493_p4 }
  0x20   : > { %p497_p1 = por %p496_p12, %p495_p13 }
  0x22   : > { %p498_p2 = pnand %p497_p1, %p491_p7 }
  0x24   : > { %501 = shalt.err (!%p498_p2)
}
  0x25   : > { %s502_s20 = scalar_lea.vmem %s733_s4, 128  ;;  %s635_s28 = smov [#allocation6]  }
  0x26   : > { %p503_p3 = scmp.ne.s32.totalorder %s733_s4, %s502_s20  ;;  %s507_s29 = sshll.u32 %s635_s28, 4  ;;  %s508_s29 = int_to_ptr.vmem [resolvable:$false] %s507_s29 }
  0x27   : > { %s509_s3 = scalar_lea.vmem %s508_s29, 256  ;;  %p510_p9 = scmp.lt.s32.totalorder %s733_s4, %s508_s29 }
  0x28   : > { %p505_p6 = pnand %p503_p3, %p489_p5  ;;  %p511_p4 = scmp.lt.s32.totalorder %s509_s3, %s502_s20 }
  0x2a   : > { %p506_p11 = pneg %p505_p6  ;;  %p512_p10 = por %p511_p4, %p510_p9 }
  0x2c   : > { %p513_p12 = pnand %p512_p10, %p506_p11 }
  0x2e   : > { %516 = shalt.err (!%p513_p12)
}
  0x2f   : > { %427 = dma.hbm_to_vmem [thread:$0]  (!%p737_p0), %s729_s30, 128, %s733_s4, %s147_s6  }
  0x30   : > { %p888_p1 = scmp.lt.s32.totalorder %s633_s14, 3  ;;  %p889_p2 = scmp.ge.s32.totalorder %s633_s14, 1 }
  0x31   : > { %s782_s16 = scalar_lea.hbm %s879_s1, %s405_s27  ;;  %s170_s18 = scalar_lea.vmem [#allocation9], %s404_s26 }
  0x32   : > { %p773_p7 = pnand %p889_p2, %p888_p1  ;;  %s179_s19 = sshll.u32 %s170_s18, 4  ;;  %s180_s19 = int_to_ptr.vmem [resolvable:$true] %s179_s19 }
  0x33   : > { %s167_s30 = scalar_lea.sflag [#allocation10], %s720_s25  ;;  %s517_s4 = scalar_lea.hbm %s782_s16, 128 }
  0x34   : > { %s890_s7 = scalar_select %p773_p7, 1, 0 }
  0x35   : > { %p518_p9 = scmp.ne.s32.totalorder %s782_s16, %s517_s4  ;;  %s522_s27 = scalar_lea.hbm %s879_s1, 256 }
  0x36   : > { %p523_p3 = scmp.lt.u32.totalorder %s782_s16, %s879_s1  ;;  %p524_p6 = scmp.lt.u32.totalorder %s522_s27, %s517_s4 }
  0x37   : > { %p520_p11 = pnand %p518_p9, %p489_p5  ;;  %p526_p10 = scmp.lt.u32.totalorder %s517_s4, %s782_s16 }
  0x38   : > { %p525_p4 = por %p524_p6, %p523_p3 }
  0x39   : > { %p521_p13 = pneg %p520_p11 }
  0x3a   : > { %p527_p12 = por %p526_p10, %p525_p4 }
  0x3c   : > { %p528_p1 = pnand %p527_p12, %p521_p13 }
  0x3e   : > { %531 = shalt.err (!%p528_p1)
}
  0x3f   : > { %s532_s25 = scalar_lea.vmem %s180_s19, 128  ;;  %s636_s26 = smov [#allocation9]  }
  0x40   : > { %p533_p2 = scmp.ne.s32.totalorder %s180_s19, %s532_s25  ;;  %s537_s3 = sshll.u32 %s636_s26, 4  ;;  %s538_s3 = int_to_ptr.vmem [resolvable:$false] %s537_s3 }
  0x41   : > { %s539_s8 = scalar_lea.vmem %s538_s3, 256  ;;  %p540_p8 = scmp.lt.s32.totalorder %s180_s19, %s538_s3 }
  0x42   : > { %p535_p9 = pnand %p533_p2, %p489_p5  ;;  %p541_p7 = scmp.lt.s32.totalorder %s539_s8, %s532_s25 }
  0x44   : > { %p536_p11 = pneg %p535_p9  ;;  %p542_p3 = por %p541_p7, %p540_p8 }
  0x46   : > { %p543_p6 = pnand %p542_p3, %p536_p11 }
  0x48   : > { %546 = shalt.err (!%p543_p6)
}
  0x49   : > { %430 = dma.hbm_to_vmem [thread:$0]  (!%p737_p0), %s782_s16, 128, %s180_s19, %s167_s30  }
  0x4a   : > { %p891_p13 = scmp.ne.s32.totalorder %s890_s7, 0 }
  0x4b   : > { %s809_s15 = sand.u32 (!%p891_p13), 1, %s617_s10   ;;  %p892_p5 = scmp.ne.s32.totalorder (!%p891_p13), %s884_s21, 0 }
  0x4c   : > { %188 = sbr.rel (%p891_p13) target bundleno = 113 (0x71), region = 28  ;;  %s409_s18 = sshll.u32 (!%p891_p13), %s809_s15, 3 }
  0x4d   : > { %s191_s4 = scalar_lea.sflag (!%p891_p13), [#allocation7], %s809_s15  ;;  %s194_s6 = scalar_lea.vmem (!%p891_p13), [#allocation6], %s409_s18 }
  0x53   : > { %600 = dma.done.wait (%p892_p5), %s191_s4, 128  }
  0x54   : > { %602 = vsyncadd (%p892_p5), %s191_s4, 4294967168  ;;  %s200_s5 = scalar_lea.sflag [#allocation10], %s809_s15  ;;  %s203_s16 = scalar_lea.vmem [#allocation9], %s409_s18 }
  0x55   : > { %604 = dma.done.wait (%p892_p5), %s200_s5, 128  }
  0x56   : > { %606 = vsyncadd (%p892_p5), %s200_s5, 4294967168  ;;  %s411_s7 = sshll.u32 %s809_s15, 5  ;;  %v239_v0 = vld [vmem:[%s194_s6] sm:$0xff]  ;;  %v240_v1 = vld [vmem:[%s203_s16] sm:$0xff]  ;;  %s417_s20 = sshll.u32 %s625_s12, 9 }
  0x57   : > { %v241_v2 = vsub.f32 %v239_v0, %v240_v1  ;;  %s228_s19 = scalar_lea.vmem [#allocation11], %s411_s7  ;;  %s829_s21 = scalar_lea.hbm %s880_s2, %s417_s20 }
  0x58   : > { %s286_s30 = sshll.u32 %s228_s19, 4  ;;  %s271_s29 = scalar_lea.sflag [#allocation8], %s809_s15  ;;  %s824_s30 = int_to_ptr.vmem [resolvable:$true] %s286_s30 }
  0x59   : > { %v242_v3 = vand.u32 2147483647, %v241_v2  ;;  %v243_v4 = vmul.f32 %v241_v2, %v241_v2  ;;  %s547_s25 = scalar_lea.vmem %s824_s30, 512  ;;  %p893_p0 = scmp.ne.s32.totalorder %s885_s22, 0 }
  0x5a   : > { %p548_p8 = scmp.ne.s32.totalorder %s824_s30, %s547_s25  ;;  %s637_s12 = smov [#allocation11]  }
  0x5b   : > { %263 = vst [vmem:[%s228_s19] sm:$0xff] %v242_v3  ;;  %267 = vst [vmem:[%s228_s19 + $0x10] sm:$0xff] %v243_v4  ;;  %v249_v5 = vmul.f32 %v243_v4, %v242_v3  ;;  %s551_s26 = sshll.u32 %s637_s12, 4  ;;  %s552_s26 = int_to_ptr.vmem [resolvable:$false] %s551_s26 }
  0x5c   : > { %269 = vst [vmem:[%s228_s19 + $0x18] sm:$0xff] %v243_v4  ;;  %p549_p7 = pnand %p548_p8, %p893_p0  ;;  %s553_s3 = scalar_lea.vmem %s552_s26, 1024 }
  0x5d   : > { %265 = vst [vmem:[%s228_s19 + $0x8] sm:$0xff] %v249_v5  ;;  %p554_p10 = scmp.lt.s32.totalorder %s824_s30, %s552_s26  ;;  %p555_p12 = scmp.lt.s32.totalorder %s553_s3, %s547_s25 }
  0x5e   : > { %p550_p4 = pneg %p549_p7 }
  0x5f   : > { %p556_p1 = por %p555_p12, %p554_p10 }
  0x61   : > { %p557_p2 = pnand %p556_p1, %p550_p4 }
  0x63   : > { %560 = shalt.err (!%p557_p2)
}
  0x64   : > { %s561_s8 = scalar_lea.hbm %s829_s21, 512  ;;  %s565_s6 = scalar_lea.hbm %s880_s2, 1024 }
  0x65   : > { %p562_p9 = scmp.ne.s32.totalorder %s829_s21, %s561_s8  ;;  %p566_p6 = scmp.lt.u32.totalorder %s829_s21, %s880_s2 }
  0x66   : > { %p567_p13 = scmp.lt.u32.totalorder %s565_s6, %s561_s8  ;;  %p569_p8 = scmp.lt.u32.totalorder %s561_s8, %s829_s21 }
  0x67   : > { %p563_p11 = pnand %p562_p9, %p893_p0 }
  0x68   : > { %p568_p5 = por %p567_p13, %p566_p6 }
  0x69   : > { %p564_p3 = pneg %p563_p11 }
  0x6a   : > { %p570_p7 = por %p569_p8, %p568_p5 }
  0x6c   : > { %p571_p4 = pnand %p570_p7, %p564_p3 }
  0x6e   : > { %574 = shalt.err (!%p571_p4)
}
  0x6f   : > { %s638_s7 = smov 128   ;;  %s639_s19 = smov 8  }
  0x70   : > { %422 = dma.vmem_to_hbm [thread:$0]  (%p893_p0), %s824_s30, 512, %s829_s21, %s271_s29, %s638_s7, %s638_s7, %s639_s19  }
  0x71 PF: > { %s301_s20 = sand.u32 1, %s613_s9   ;;  %p894_p10 = scmp.ne.s32.totalorder %s886_s24, 0 }
  0x72   : > { %p895_p12 = scmp.ge.s32.totalorder %s633_s14, 2  ;;  %s302_s27 = scalar_lea.sflag [#allocation8], %s301_s20 }
  0x74   : > { %p432_p1 = pnand %p895_p12, %p894_p10 }
  0x76   : > { %608 = dma.done.wait (!%p432_p1), %s302_s27, 512  }
  0x77   : > { %610 = vsyncadd (!%p432_p1), %s302_s27, 4294966784  ;;  %s21_s14 = sadd.s32 1, %s633_s14   ;;  %s896_s9 = smov %s617_s10 }
  0x78   : > { %p18_p2 = scmp.ge.s32.totalorder %s21_s14, 4   ;;  %s897_s10 = smov %s621_s11 }
  0x79   : > { %s898_s11 = smov %s711_s23  ;;  %s899_s12 = smov %s629_s13 }
  0x7a   : > { %s900_s13 = smov %s902_s17  ;;  %20 = sbr.rel (!%p18_p2) target bundleno = 8 (0x8), region = 94 }
  0x81   :  { %307 = vsyncpa [#allocation7], 1 }
  0x82   :  { %309 = vsyncpa [#allocation7 + $0x1], 1 }
  0x83   :  { %310 = vsyncpa [#allocation10], 1 }
  0x84   :  { %312 = vsyncpa [#allocation10 + $0x1], 1 }
  0x85   :  { %313 = vsyncpa [#allocation8], 1 }
  0x86   :  { %315 = vsyncpa [#allocation8 + $0x1], 1 }

</bundles_post_ra>
